<compile_context>
chip_gen: v5e
topology: v5e:2x2
jax: 0.10.0
libtpu: 0.0.40
codegen_flags: <defaults>
</compile_context>

<pallas_src>
import functools
import math

import jax
import jax.numpy as jnp
from jax.experimental import pallas as pl
from jax.experimental.pallas import tpu as pltpu

LN_EPS = 1e-5  # torch.nn.LayerNorm default


def _patch_merge_kernel(x_ref, wa_ref, wb_ref, wp_ref, o_ref):
    # x_ref:  (nbh, 2, Wo, 2C)  raw 2x2 neighborhoods (dim 1 = input-row parity)
    # wa_ref: (2C, 2Co)         gamma-folded weight rows for [x0 | x2]
    # wb_ref: (2C, 2Co)         gamma-folded weight rows for [x1 | x3]
    # wp_ref: (2, 2Co)          row 0 = column sums of full folded weight,
    #                           row 1 = beta @ W^T
    # o_ref:  (nbh*Wo, 2Co)
    nbh, _, wo, c2 = x_ref.shape
    m = nbh * wo

    xa = x_ref[:, 0, :, :].reshape(m, c2)   # even input rows -> [x0 | x2]
    xb = x_ref[:, 1, :, :].reshape(m, c2)   # odd  input rows -> [x1 | x3]

    # LayerNorm statistics over all 4C channels, one pass, f32.
    # Fuse the two slabs elementwise first -> only 2 cross-lane (XLU) reduces.
    xa_f = xa.astype(jnp.float32)
    xb_f = xb.astype(jnp.float32)
    t1 = xa_f + xb_f
    t2 = xa_f * xa_f + xb_f * xb_f
    s1 = jnp.sum(t1, axis=-1, keepdims=True)
    s2 = jnp.sum(t2, axis=-1, keepdims=True)
    inv_n = 1.0 / (2 * c2)                      # 1 / (4C)
    mean = s1 * inv_n
    var = jnp.maximum(s2 * inv_n - mean * mean, 0.0)
    rstd = jax.lax.rsqrt(var + LN_EPS)

    # Matmul on the raw input dtype (bf16 stays bf16 on the MXU), f32 accum.
    acc = jnp.dot(xa, wa_ref[...], preferred_element_type=jnp.float32)
    acc = acc + jnp.dot(xb, wb_ref[...], preferred_element_type=jnp.float32)

    # LN centering/scale applied after the matmul (exact algebraic refactor).
    wsum = wp_ref[0:1, :]
    bias = wp_ref[1:2, :]
    out = (acc - mean * wsum) * rstd + bias
    o_ref[...] = out.astype(o_ref.dtype)


def _vmem_limit_bytes() -> int:
    """Generation-aware scoped-VMEM limit (~100 MiB on v5e/v6e, ~50 MiB on v7x)."""
    cap = 64 * 1024 * 1024
    try:
        info = pltpu.get_tpu_info()
        cap = int(getattr(info, "vmem_capacity_bytes", cap))
    except Exception:
        pass
    return min(int(cap * 0.78), 100 * 1024 * 1024)


@functools.partial(jax.jit, static_argnames=("H", "W"))
def patch_merging(x, H, W, gamma, beta, w_red):
    """PatchMerging forward.

    Args:
      x:      (B, H*W, C) input features.
      H, W:   spatial resolution (static).
      gamma:  (4C,) LayerNorm weight.
      beta:   (4C,) LayerNorm bias.
      w_red:  (2C, 4C) reduction Linear weight (torch convention, no bias).

    Returns:
      (B, ceil(H/2)*ceil(W/2), 2C)
    """
    B, L, C = x.shape
    assert L == H * W, "input feature has wrong size"

    Ho, Wo = (H + 1) // 2, (W + 1) // 2
    x = x.reshape(B, H, W, C)
    if H % 2 or W % 2:  # only copies when the spatial size is odd (as in torch)
        x = jnp.pad(x, ((0, 0), (0, H % 2), (0, W % 2), (0, 0)))

    BH = B * Ho
    C2 = 2 * C
    C4 = 4 * C
    # Free, contiguous view:
    #   x5[bh, r, wo, :] = [x[b, 2*ho + r, 2*wo, :], x[b, 2*ho + r, 2*wo + 1, :]]
    x5 = x.reshape(BH, 2, Wo, C2)

    # Fold LN affine into the reduction weight (exact), permute rows into the
    # gathered channel order [x0|x2] / [x1|x3].
    f32 = jnp.float32
    Wt = w_red.astype(f32).T                          # (4C, 2Co), torch order
    Wg = gamma.astype(f32)[:, None] * Wt              # gamma folded
    wsum = jnp.sum(Wg, axis=0)                        # (2Co,)
    bias = beta.astype(f32) @ Wt                      # (2Co,)
    wparams = jnp.stack([wsum, bias], axis=0)         # (2, 2Co) f32
    Wa = jnp.concatenate([Wg[0:C], Wg[2 * C:3 * C]], axis=0).astype(x.dtype)      # [x0|x2]
    Wb = jnp.concatenate([Wg[C:2 * C], Wg[3 * C:4 * C]], axis=0).astype(x.dtype)  # [x1|x3]
    C2o = Wt.shape[1]                                 # = 2C

    # ---- Tile selection -----------------------------------------------------
    # Fill the VMEM budget (amortize per-step overhead); model the f32
    # temporaries the kernel materializes, not just the bf16/f32 in/out tiles.
    in_b = x.dtype.itemsize
    out_b = in_b
    f32_b = 4
    in_row = Wo * C4 * in_b                           # raw 2x2 neighborhoods / BH row
    out_row = Wo * C2o * out_b
    tmp_row = Wo * (2 * C4 + 3 * C2o) * f32_b         # xa_f,xb_f,t1,t2,acc,f32 out
    bytes_per_row = 2 * in_row + 2 * out_row + tmp_row  # in/out double-buffered

    w_bytes = 2 * C2 * C2o * in_b                     # Wa + Wb (resident)
    wp_bytes = 2 * C2o * f32_b
    headroom = 6 * 1024 * 1024

    vmem_limit = _vmem_limit_bytes()
    budget = vmem_limit - 2 * (w_bytes + wp_bytes) - headroom
    budget = max(budget, bytes_per_row)
    nbh_cap = max(1, budget // bytes_per_row)
    nbh_io_cap = max(1, (16 * 1024 * 1024) // in_row)  # ~16 MiB of input / step

    nbh = min(BH, nbh_cap, nbh_io_cap)
    if BH >= 2:
        nbh = min(nbh, pl.cdiv(BH, 2))    # grid >= 2: both v7x TensorCores get work

    # The 2-D output block's sublane extent (nbh*Wo) must be a multiple of the
    # packed sublane count unless a single block covers the whole token axis.
    # Round DOWN (never past the budget); fall back to the smallest legal step.
    sub = max(8, 32 // out_b)                         # 8 f32 / 16 bf16 / 32 int8
    step = sub // math.gcd(Wo, sub)
    if nbh < BH:
        if nbh >= step:
            nbh = (nbh // step) * step
        else:
            nbh = min(step, BH)
    nbh = max(1, min(nbh, BH))

    grid = int(pl.cdiv(BH, nbh))
    if grid > 1 and grid % 2 == 1:
        # Prefer an even number of grid steps so the 2 TCs on v7x split evenly.
        cand = int(pl.cdiv(BH, grid + 1))
        if cand >= step:
            cand = (cand // step) * step
            if cand >= 1 and int(pl.cdiv(BH, cand)) % 2 == 0:
                nbh = cand
                grid = int(pl.cdiv(BH, nbh))

    M = BH * Wo

    # NOTE: for tiny C (2C < 128, e.g. this unit test) the output stores are
    # lane-masked; real Swin stages (C >= 96) are lane-dense and unaffected.
    out = pl.pallas_call(
        _patch_merge_kernel,
        out_shape=jax.ShapeDtypeStruct((M, C2o), x.dtype),
        grid_spec=pltpu.PrefetchScalarGridSpec(
            num_scalar_prefetch=0,
            grid=(grid,),
            in_specs=[
                pl.BlockSpec((nbh, 2, Wo, C2), lambda i: (i, 0, 0, 0)),
                pl.BlockSpec((C2, C2o), lambda i: (0, 0)),   # Wa (resident)
                pl.BlockSpec((C2, C2o), lambda i: (0, 0)),   # Wb (resident)
                pl.BlockSpec((2, C2o), lambda i: (0, 0)),    # [wsum; bias]
            ],
            out_specs=pl.BlockSpec((nbh * Wo, C2o), lambda i: (i, 0)),
        ),
        compiler_params=pltpu.CompilerParams(
            dimension_semantics=("parallel",),   # token axis shards across v7x's 2 TCs
            vmem_limit_bytes=vmem_limit,
        ),
    )(x5, Wa, Wb, wparams)

    return out.reshape(B, Ho * Wo, C2o)


def _reference(x, H, W, gamma, beta, w_red):
    B, L, C = x.shape
    x = x.reshape(B, H, W, C)
    if H % 2 or W % 2:
        x = jnp.pad(x, ((0, 0), (0, H % 2), (0, W % 2), (0, 0)))
    x0 = x[:, 0::2, 0::2, :]
    x1 = x[:, 1::2, 0::2, :]
    x2 = x[:, 0::2, 1::2, :]
    x3 = x[:, 1::2, 1::2, :]
    xcat = jnp.concatenate([x0, x1, x2, x3], axis=-1)
    xcat = xcat.reshape(B, -1, 4 * C).astype(jnp.float32)
    mean = jnp.mean(xcat, axis=-1, keepdims=True)
    var = jnp.mean((xcat - mean) ** 2, axis=-1, keepdims=True)
    xn = (xcat - mean) / jnp.sqrt(var + LN_EPS) * gamma + beta
    return jnp.einsum("blk,ok->blo", xn, w_red.astype(jnp.float32))


if __name__ == "__main__":
    B, dim, H, W = 2, 4, 16, 16  # x: (B, H*W, C) = (2, 256, 4)
    key = jax.random.PRNGKey(0)
    kx, kw, kg, kb = jax.random.split(key, 4)

    x = jax.random.normal(kx, (B, H * W, dim), dtype=jnp.float32)
    # Shapes from nn.Linear(4*dim, 2*dim, bias=False) and nn.LayerNorm(4*dim).
    w_red = jax.random.normal(kw, (2 * dim, 4 * dim), dtype=jnp.float32) * 0.1
    gamma = 1.0 + 0.05 * jax.random.normal(kg, (4 * dim,), dtype=jnp.float32)
    beta = 0.05 * jax.random.normal(kb, (4 * dim,), dtype=jnp.float32)

    out = patch_merging(x, H, W, gamma, beta, w_red)
    out = jax.block_until_ready(out)

    ref = _reference(x, H, W, gamma, beta, w_red)
    assert out.shape == (B, (H // 2) * (W // 2), 2 * dim), out.shape
    assert jnp.allclose(out, ref, atol=1e-4, rtol=1e-4), float(
        jnp.max(jnp.abs(out - ref))
    )
    print("KERNEL_OK")
</pallas_src>

<mosaic_0001>
module attributes {stable_mosaic.version = 11 : i64} {
  func.func @_patch_merge_kernel(%arg0: i32, %arg1: memref<8x2x8x8xf32, #tpu.memory_space<vmem>>, %arg2: memref<8x8xf32, #tpu.memory_space<vmem>>, %arg3: memref<8x8xf32, #tpu.memory_space<vmem>>, %arg4: memref<2x8xf32, #tpu.memory_space<vmem>>, %arg5: memref<64x8xf32, #tpu.memory_space<vmem>>) attributes {dimension_semantics = [#tpu.dimension_semantics<parallel>], iteration_bounds = array<i64: 2>, scalar_prefetch = 0 : i64, scratch_operands = 0 : i64, tpu.core_type = #tpu.core_type<tc>, window_params = [{transform_indices = @transform_0, window_bounds = array<i64: 8, 2, 8, 8>}, {pipeline_mode = #tpu.pipeline_mode<synchronous>, transform_indices = @transform_1, window_bounds = array<i64: 8, 8>}, {pipeline_mode = #tpu.pipeline_mode<synchronous>, transform_indices = @transform_2, window_bounds = array<i64: 8, 8>}, {pipeline_mode = #tpu.pipeline_mode<synchronous>, transform_indices = @transform_3, window_bounds = array<i64: 2, 8>}, {transform_indices = @transform_4, window_bounds = array<i64: 64, 8>}]} {
    %c0 = arith.constant 0 : index
    %c0_0 = arith.constant 0 : index
    %c0_1 = arith.constant 0 : index
    %c0_2 = arith.constant 0 : index
    %0 = vector.load %arg1[%c0, %c0_0, %c0_1, %c0_2] : memref<8x2x8x8xf32, #tpu.memory_space<vmem>>, vector<8x1x8x8xf32>
    %1 = vector.shape_cast %0 : vector<8x1x8x8xf32> to vector<8x8x8xf32>
    %2 = vector.shape_cast %1 : vector<8x8x8xf32> to vector<64x8xf32>
    %c0_3 = arith.constant 0 : index
    %c1 = arith.constant 1 : index
    %c0_4 = arith.constant 0 : index
    %c0_5 = arith.constant 0 : index
    %3 = vector.load %arg1[%c0_3, %c1, %c0_4, %c0_5] : memref<8x2x8x8xf32, #tpu.memory_space<vmem>>, vector<8x1x8x8xf32>
    %4 = vector.shape_cast %3 : vector<8x1x8x8xf32> to vector<8x8x8xf32>
    %5 = vector.shape_cast %4 : vector<8x8x8xf32> to vector<64x8xf32>
    %6 = arith.addf %2, %5 : vector<64x8xf32>
    %7 = arith.mulf %2, %2 : vector<64x8xf32>
    %8 = arith.mulf %5, %5 : vector<64x8xf32>
    %9 = arith.addf %7, %8 : vector<64x8xf32>
    %cst = arith.constant dense<0.000000e+00> : vector<64xf32>
    %10 = vector.multi_reduction <add>, %6, %cst [1] : vector<64x8xf32> to vector<64xf32>
    %11 = vector.shape_cast %10 : vector<64xf32> to vector<64x1xf32>
    %cst_6 = arith.constant dense<0.000000e+00> : vector<64xf32>
    %12 = vector.multi_reduction <add>, %9, %cst_6 [1] : vector<64x8xf32> to vector<64xf32>
    %13 = vector.shape_cast %12 : vector<64xf32> to vector<64x1xf32>
    %cst_7 = arith.constant 6.250000e-02 : f32
    %14 = vector.broadcast %cst_7 : f32 to vector<64x1xf32>
    %15 = arith.mulf %11, %14 : vector<64x1xf32>
    %cst_8 = arith.constant 6.250000e-02 : f32
    %16 = vector.broadcast %cst_8 : f32 to vector<64x1xf32>
    %17 = arith.mulf %13, %16 : vector<64x1xf32>
    %18 = arith.mulf %15, %15 : vector<64x1xf32>
    %19 = arith.subf %17, %18 : vector<64x1xf32>
    %cst_9 = arith.constant 0.000000e+00 : f32
    %20 = vector.broadcast %cst_9 : f32 to vector<64x1xf32>
    %21 = arith.maximumf %19, %20 : vector<64x1xf32>
    %cst_10 = arith.constant 9.99999974E-6 : f32
    %22 = vector.broadcast %cst_10 : f32 to vector<64x1xf32>
    %23 = arith.addf %21, %22 : vector<64x1xf32>
    %24 = math.rsqrt %23 : vector<64x1xf32>
    %c0_11 = arith.constant 0 : index
    %c0_12 = arith.constant 0 : index
    %25 = vector.load %arg2[%c0_11, %c0_12] : memref<8x8xf32, #tpu.memory_space<vmem>>, vector<8x8xf32>
    %cst_13 = arith.constant dense<0.000000e+00> : vector<64x8xf32>
    %26 = tpu.matmul %2, %25, %cst_13 {dimension_numbers = #tpu.dot_dimension_numbers<[1], [0], [0], [1], [0, 0, 1, 1], [], []>} : vector<64x8xf32>, vector<8x8xf32>, vector<64x8xf32> -> vector<64x8xf32>
    %c0_14 = arith.constant 0 : index
    %c0_15 = arith.constant 0 : index
    %27 = vector.load %arg3[%c0_14, %c0_15] : memref<8x8xf32, #tpu.memory_space<vmem>>, vector<8x8xf32>
    %cst_16 = arith.constant dense<0.000000e+00> : vector<64x8xf32>
    %28 = tpu.matmul %5, %27, %cst_16 {dimension_numbers = #tpu.dot_dimension_numbers<[1], [0], [0], [1], [0, 0, 1, 1], [], []>} : vector<64x8xf32>, vector<8x8xf32>, vector<64x8xf32> -> vector<64x8xf32>
    %29 = arith.addf %26, %28 : vector<64x8xf32>
    %c0_17 = arith.constant 0 : index
    %c0_18 = arith.constant 0 : index
    %30 = vector.load %arg4[%c0_17, %c0_18] : memref<2x8xf32, #tpu.memory_space<vmem>>, vector<1x8xf32>
    %c1_19 = arith.constant 1 : index
    %c0_20 = arith.constant 0 : index
    %31 = vector.load %arg4[%c1_19, %c0_20] : memref<2x8xf32, #tpu.memory_space<vmem>>, vector<1x8xf32>
    %32 = vector.broadcast %15 : vector<64x1xf32> to vector<64x8xf32>
    %33 = vector.broadcast %30 : vector<1x8xf32> to vector<64x8xf32>
    %34 = arith.mulf %32, %33 : vector<64x8xf32>
    %35 = arith.subf %29, %34 : vector<64x8xf32>
    %36 = vector.broadcast %24 : vector<64x1xf32> to vector<64x8xf32>
    %37 = arith.mulf %35, %36 : vector<64x8xf32>
    %38 = vector.broadcast %31 : vector<1x8xf32> to vector<64x8xf32>
    %39 = arith.addf %37, %38 : vector<64x8xf32>
    %c0_21 = arith.constant 0 : index
    %c0_22 = arith.constant 0 : index
    %40 = vector.load %arg5[%c0_21, %c0_22] : memref<64x8xf32, #tpu.memory_space<vmem>>, vector<64x8xf32>
    tpu.vector_store %arg5[%c0_21, %c0_22], %39 {strides = array<i32>} : memref<64x8xf32, #tpu.memory_space<vmem>>, vector<64x8xf32>,
    return
  }
  func.func @transform_0(%arg0: i32) -> (i32, i32, i32, i32) {
    %c0_i32 = arith.constant 0 : i32
    %c0_i32_0 = arith.constant 0 : i32
    %c0_i32_1 = arith.constant 0 : i32
    %c0_i32_2 = arith.constant 0 : i32
    return %arg0, %c0_i32, %c0_i32_0, %c0_i32_1 : i32, i32, i32, i32
  }
  func.func @transform_1(%arg0: i32) -> (i32, i32) {
    %c0_i32 = arith.constant 0 : i32
    %c0_i32_0 = arith.constant 0 : i32
    %c0_i32_1 = arith.constant 0 : i32
    return %c0_i32, %c0_i32_0 : i32, i32
  }
  func.func @transform_2(%arg0: i32) -> (i32, i32) {
    %c0_i32 = arith.constant 0 : i32
    %c0_i32_0 = arith.constant 0 : i32
    %c0_i32_1 = arith.constant 0 : i32
    return %c0_i32, %c0_i32_0 : i32, i32
  }
  func.func @transform_3(%arg0: i32) -> (i32, i32) {
    %c0_i32 = arith.constant 0 : i32
    %c0_i32_0 = arith.constant 0 : i32
    %c0_i32_1 = arith.constant 0 : i32
    return %c0_i32, %c0_i32_0 : i32, i32
  }
  func.func @transform_4(%arg0: i32) -> (i32, i32) {
    %c0_i32 = arith.constant 0 : i32
    %c0_i32_0 = arith.constant 0 : i32
    return %arg0, %c0_i32 : i32, i32
  }
}

</mosaic_0001>

<bundles_post_ra>
// kernel: patch_merging.1
= control target key start
LH: loop header
LB: loop body
LE: loop exit
PB: predicated region body
PF: predicated region fallthrough
CT: control target
= control target key end

     0   :  { %s760_s15 = smov 0   ;;  %s1013_s0 = inlined_call_operand.vmem [shape: f32[16,2,8,8], index: 0, kind: input, shape index: {}]   ;;  %s1014_s1 = inlined_call_operand.vmem [shape: f32[8,8], index: 1, kind: input, shape index: {}]   ;;  %s1015_s2 = inlined_call_operand.vmem [shape: f32[8,8], index: 2, kind: input, shape index: {}]   ;;  %s1016_s3 = inlined_call_operand.vmem [shape: f32[2,8], index: 3, kind: input, shape index: {}]   ;;  %s1017_s4 = inlined_call_operand.vmem [shape: f32[128,8], index: 4, kind: output, shape index: {}]  }
   0x1 LB: > { %s662_s16 = sadd.s32 4294967295, %s733_s15   ;;  %p666_p0 = scmp.ge.s32.totalorder %s733_s15, 1  ;;  %s733_s15 = sphi %s760_s15, %s14_s15  }
   0x2   : > { %p164_p1 = scmp.lt.s32.totalorder %s733_s15, 3 }
   0x4   : > { %p165_p2 = pnand %p666_p0, %p164_p1 }
   0x5   : > { %s667_s21 = sshll.u32 (!%p165_p2), %s662_s16, 3 }
   0x6   : > { %168 = sbr.rel (%p165_p2) target bundleno = 207 (0xcf), region = 36  ;;  %p192_p3 = scmp.lt.s32.totalorder (!%p165_p2), %s667_s21, 15 }
   0xb   : > { %v431_v0 = vld [vmem:[%s1015_s2] sm:$0xff]  ;;  %s1019_s21 = smov (!%p192_p3, %s667_s21), 15  ;;  %vm253_vm0 = vcmask 64512  }
   0xc   : > { %v430_v1 = vld [vmem:[%s1014_s1] sm:$0xff]  ;;  %471 = vmatpush.msra.mxu0 %v431_v0  ;;  %699 = vmatpush.msra.mxu2 %v431_v0  ;;  %s698_s22 = sshll.u32 %s1019_s21, 4  ;;  %s671_s28 = sshll.u32 %s1019_s21, 3 }
   0xd   : > { %536 = vmatpush.msra.mxu1 %v430_v1  ;;  %700 = vmatpush.msra.mxu3 %v430_v1  ;;  %s780_s25 = scalar_lea.vmem %s1013_s0, %s698_s22  ;;  %s937_s7 = scalar_lea.vmem %s1017_s4, %s671_s28 }
   0xe   : > { %v672_v2 = vld [vmem:[%s780_s25 + $0x8] sm:$0xff]  ;;  %v204_v4 = vld [vmem:[%s780_s25] sm:$0xff]  ;;  %v677_v10 = vld [vmem:[%s780_s25 + $0x58] sm:$0xff] }
   0xf   : > { %v784_v3 = vld [vmem:[%s780_s25 + $0x48] sm:$0xff]  ;;  %680 = vmatmul.msk.f32.vlgmr.msra.gmra.mxu0 %vm253_vm0, %v672_v2  ;;  %v791_v5 = vld [vmem:[%s780_s25 + $0x40] sm:$0xff]  ;;  %688 = vmatmul.msk.f32.vlgmr.msra.gmra.mxu1 %vm253_vm0, %v204_v4  ;;  %v221_v11 = vadd.f32 %v672_v2, %v204_v4  ;;  %v209_v12 = vld [vmem:[%s780_s25 + $0x50] sm:$0xff]  ;;  %v237_v23 = vmul.f32 %v672_v2, %v672_v2  ;;  %v229_v24 = vmul.f32 %v204_v4, %v204_v4 }
  0x10   : > { %684 = vmatmul.msk.f32.vlgmr.msra.gmra.mxu2 %vm253_vm0, %v784_v3  ;;  %v206_v6 = vld [vmem:[%s780_s25 + $0x20] sm:$0xff]  ;;  %v674_v7 = vld [vmem:[%s780_s25 + $0x28] sm:$0xff]  ;;  %692 = vmatmul.msk.f32.vlgmr.msra.gmra.mxu3 %vm253_vm0, %v791_v5  ;;  %v225_v8 = vadd.f32 %v784_v3, %v791_v5  ;;  %v207_v13 = vld [vmem:[%s780_s25 + $0x30] sm:$0xff]  ;;  %v226_v20 = vadd.f32 %v677_v10, %v209_v12  ;;  %v242_v47 = vmul.f32 %v677_v10, %v677_v10 }
  0x11   : > { %v223_v9 = vadd.f32 %v674_v7, %v206_v6  ;;  %v675_v14 = vld [vmem:[%s780_s25 + $0x38] sm:$0xff]  ;;  %v205_v18 = vld [vmem:[%s780_s25 + $0x10] sm:$0xff]  ;;  %v254_v19 = vsel %vm253_vm0, %v221_v11, 0.0  ;;  %v678_v30 = vld [vmem:[%s780_s25 + $0x68] sm:$0xff]  ;;  %v245_v33 = vadd.f32 %v237_v23, %v229_v24  ;;  %v231_v36 = vmul.f32 %v206_v6, %v206_v6 }
  0x12   : > { %v266_v15 = vsel %vm253_vm0, %v225_v8, 0.0  ;;  %v673_v17 = vld [vmem:[%s780_s25 + $0x18] sm:$0xff]  ;;  %255 = vadd.xlane.f32.xlu0 %v254_v19  ;;  %v224_v21 = vadd.f32 %v675_v14, %v207_v13  ;;  %v269_v25 = vsel %vm253_vm0, %v226_v20, 0.0  ;;  %v211_v27 = vld [vmem:[%s780_s25 + $0x70] sm:$0xff]  ;;  %v210_v31 = vld [vmem:[%s780_s25 + $0x60] sm:$0xff]  ;;  %v239_v38 = vmul.f32 %v674_v7, %v674_v7 }
  0x13   : > { %v260_v16 = vsel %vm253_vm0, %v223_v9, 0.0  ;;  %267 = vadd.xlane.f32.xlu2 %v266_v15  ;;  %v222_v22 = vadd.f32 %v673_v17, %v205_v18  ;;  %v679_v28 = vld [vmem:[%s780_s25 + $0x78] sm:$0xff]  ;;  %v227_v34 = vadd.f32 %v678_v30, %v210_v31  ;;  %v278_v37 = vsel %vm253_vm0, %v245_v33, 0.0 }
  0x14   : > { %261 = vadd.xlane.f32.xlu1 %v260_v16  ;;  %v263_v26 = vsel %vm253_vm0, %v224_v21, 0.0  ;;  %v228_v32 = vadd.f32 %v679_v28, %v211_v27  ;;  %v232_v39 = vmul.f32 %v207_v13, %v207_v13  ;;  %v240_v40 = vmul.f32 %v675_v14, %v675_v14 }
  0x15   : > { %v257_v29 = vsel %vm253_vm0, %v222_v22, 0.0  ;;  %v238_v41 = vmul.f32 %v673_v17, %v673_v17  ;;  %v230_v42 = vmul.f32 %v205_v18, %v205_v18  ;;  %v272_v43 = vsel %vm253_vm0, %v227_v34, 0.0 }
  0x16   : > { %v275_v35 = vsel %vm253_vm0, %v228_v32, 0.0  ;;  %v247_v44 = vadd.f32 %v239_v38, %v231_v36  ;;  %v248_v45 = vadd.f32 %v240_v40, %v232_v39  ;;  %v234_v48 = vmul.f32 %v209_v12, %v209_v12 }
  0x17   : > { %681 = vmatmul.msk.f32.gmra.mxu0 %vm253_vm0, %v673_v17  ;;  %689 = vmatmul.msk.f32.gmra.mxu1 %vm253_vm0, %v205_v18  ;;  %v246_v46 = vadd.f32 %v238_v41, %v230_v42  ;;  %v243_v49 = vmul.f32 %v678_v30, %v678_v30  ;;  %v235_v50 = vmul.f32 %v210_v31, %v210_v31 }
  0x18   : > { %685 = vmatmul.msk.f32.gmra.mxu2 %vm253_vm0, %v677_v10  ;;  %693 = vmatmul.msk.f32.gmra.mxu3 %vm253_vm0, %v209_v12  ;;  %v284_v51 = vsel %vm253_vm0, %v247_v44, 0.0  ;;  %v287_v52 = vsel %vm253_vm0, %v248_v45, 0.0  ;;  %v241_v53 = vmul.f32 %v784_v3, %v784_v3  ;;  %v233_v54 = vmul.f32 %v791_v5, %v791_v5 }
  0x19   : > { %v281_v55 = vsel %vm253_vm0, %v246_v46, 0.0  ;;  %v250_v56 = vadd.f32 %v242_v47, %v234_v48  ;;  %v251_v57 = vadd.f32 %v243_v49, %v235_v50  ;;  %v236_v62 = vmul.f32 %v211_v27, %v211_v27  ;;  %v870_v49 = vld [vmem:[%s1016_s3] ss:$0 sm:$0xff] }
  0x1a   : > { %258 = vadd.xlane.f32.xlu0 %v257_v29  ;;  %v249_v58 = vadd.f32 %v241_v53, %v233_v54  ;;  %v244_v63 = vmul.f32 %v679_v28, %v679_v28 }
  0x1b   : > { %270 = vadd.xlane.f32.xlu2 %v269_v25  ;;  %v293_v59 = vsel %vm253_vm0, %v250_v56, 0.0  ;;  %v296_v60 = vsel %vm253_vm0, %v251_v57, 0.0 }
  0x1c   : > { %264 = vadd.xlane.f32.xlu1 %v263_v26  ;;  %v290_v61 = vsel %vm253_vm0, %v249_v58, 0.0  ;;  %v252_v0 = vadd.f32 %v244_v63, %v236_v62 }
  0x1e   : > { %v299_v1 = vsel %vm253_vm0, %v252_v0, 0.0 }
  0x1f   : > { %682 = vmatmul.msk.f32.gmra.mxu0 %vm253_vm0, %v674_v7  ;;  %690 = vmatmul.msk.f32.gmra.mxu1 %vm253_vm0, %v206_v6 }
  0x20   : > { %686 = vmatmul.msk.f32.gmra.mxu2 %vm253_vm0, %v678_v30  ;;  %694 = vmatmul.msk.f32.gmra.mxu3 %vm253_vm0, %v210_v31 }
  0x22   : > { %273 = vadd.xlane.f32.xlu0 %v272_v43 }
  0x23   : > { %279 = vadd.xlane.f32.xlu2 %v278_v37 }
  0x24   : > { %276 = vadd.xlane.f32.xlu1 %v275_v35 }
  0x27   : > { %683 = vmatmul.msk.f32.gmra.mxu0 %vm253_vm0, %v675_v14  ;;  %691 = vmatmul.msk.f32.gmra.mxu1 %vm253_vm0, %v207_v13 }
  0x28   : > { %687 = vmatmul.msk.f32.gmra.mxu2 %vm253_vm0, %v679_v28  ;;  %695 = vmatmul.msk.f32.gmra.mxu3 %vm253_vm0, %v211_v27 }
  0x2a   : > { %282 = vadd.xlane.f32.xlu0 %v281_v55 }
  0x2b   : > { %288 = vadd.xlane.f32.xlu2 %v287_v52 }
  0x2c   : > { %285 = vadd.xlane.f32.xlu1 %v284_v51 }
  0x32   : > { %291 = vadd.xlane.f32.xlu0 %v290_v61 }
  0x33   : > { %297 = vadd.xlane.f32.xlu2 %v296_v60 }
  0x34   : > { %294 = vadd.xlane.f32.xlu1 %v293_v59 }
  0x3a   : > { %300 = vadd.xlane.f32.xlu0 %v299_v1 }
  0x85   : > { %v256_v4 = vpop.xlane.xlu0 %255 }
  0x86   : > { %v268_v2 = vpop.xlane.xlu2 %267  ;;  %v302_v10 = vmul.f32 0.0625, %v256_v4 }
  0x87   : > { %v262_v3 = vpop.xlane.xlu1 %261  ;;  %v855_v36 = vmul.f32 0.0625, %v268_v2 }
  0x88   : > { %v318_v13 = vmul.f32 %v302_v10, %v302_v10  ;;  %v304_v17 = vmul.f32 0.0625, %v262_v3  ;;  %v565_v63 = vmul.f32 %v870_v49, %v302_v10 }
  0x89   : > { %v322_v54 = vmul.f32 %v855_v36, %v855_v36 }
  0x8a   : > { %v320_v24 = vmul.f32 %v304_v17, %v304_v17  ;;  %v884_v2 = vmul.f32 %v870_v49, %v304_v17 }
  0x8c   : > { %v473_v8 = vpop.f32.mrf.mxu0  ;;  %v538_v9 = vpop.f32.mrf.mxu1 }
  0x8d   : > { %v259_v7 = vpop.xlane.xlu0 %258  ;;  %v539_v55 = vadd.f32 %v538_v9, %v473_v8 }
  0x8e   : > { %v271_v5 = vpop.xlane.xlu2 %270  ;;  %v848_v22 = vmul.f32 0.0625, %v259_v7 }
  0x8f   : > { %v265_v6 = vpop.xlane.xlu1 %264  ;;  %v307_v39 = vmul.f32 0.0625, %v271_v5  ;;  %v573_v5 = vsub.f32 %v539_v55, %v565_v63 }
  0x90   : > { %v305_v18 = vmul.f32 0.0625, %v265_v6  ;;  %v319_v31 = vmul.f32 %v848_v22, %v848_v22 }
  0x91   : > { %v323_v57 = vmul.f32 %v307_v39, %v307_v39  ;;  %v889_v9 = vmul.f32 %v870_v49, %v307_v39 }
  0x92   : > { %v321_v27 = vmul.f32 %v305_v18, %v305_v18 }
  0x93   : > { %v857_v40 = vpop.f32.mrf.mxu2  ;;  %v859_v41 = vpop.f32.mrf.mxu3 }
  0x94   : > { %v844_v19 = vpop.f32.mrf.mxu0  ;;  %v846_v20 = vpop.f32.mrf.mxu1 }
  0x95   : > { %v274_v15 = vpop.xlane.xlu0 %273  ;;  %v542_v39 = vadd.f32 %v846_v20, %v844_v19 }
  0x96   : > { %v280_v12 = vpop.xlane.xlu2 %279  ;;  %v861_v44 = vmul.f32 0.0625, %v274_v15 }
  0x97   : > { %v842_v11 = vpop.xlane.xlu1 %276  ;;  %v310_v14 = vmul.f32 0.0625, %v280_v12  ;;  %v892_v12 = vmul.f32 %v870_v49, %v305_v18  ;;  %v911_v18 = vld [vmem:[%s1016_s3 + $0x1] ss:$0 sm:$0xff] }
  0x98   : > { %v324_v60 = vmul.f32 %v861_v44, %v861_v44 }
  0x99   : > { %v326_v16 = vsub.f32 %v310_v14, %v318_v13 }
  0x9b   : > { %v334_v21 = vmax.f32 %v326_v16, 0.0 }
  0x9c   : > { %v479_v45 = vpop.f32.mrf.mxu0  ;;  %v544_v46 = vpop.f32.mrf.mxu1 }
  0x9d   : > { %v850_v23 = vadd.f32 1e-05, %v334_v21  ;;  %v283_v30 = vpop.xlane.xlu0 %282 }
  0x9e   : > { %v289_v26 = vpop.xlane.xlu2 %288  ;;  %v311_v32 = vmul.f32 0.0625, %v283_v30 }
  0x9f   : > { %v286_v25 = vpop.xlane.xlu1 %285  ;;  %711 = vrsqrt.f32 %v850_v23  ;;  %v313_v29 = vmul.f32 0.0625, %v289_v26  ;;  %vm356_vm2 = vweird.f32 %v850_v23 }
  0xa0   : > { %v312_v28 = vmul.f32 0.0625, %v286_v25  ;;  %v327_v35 = vsub.f32 %v311_v32, %v319_v31  ;;  %v914_v25 = vpop.f32.mrf.mxu2 }
  0xa1   : > { %v329_v34 = vsub.f32 %v313_v29, %v321_v27 }
  0xa2   : > { %v328_v33 = vsub.f32 %v312_v28, %v320_v24  ;;  %v335_v42 = vmax.f32 %v327_v35, 0.0  ;;  %v906_v24 = vmul.f32 %v870_v49, %v848_v22  ;;  %v925_v22 = vmul.f32 0.0625, %v842_v11 }
  0xa3   : > { %v337_v38 = vmax.f32 %v329_v34, 0.0  ;;  %v545_v35 = vadd.f32 %v544_v46, %v479_v45 }
  0xa4   : > { %v336_v37 = vmax.f32 %v328_v33, 0.0  ;;  %v873_v51 = vadd.f32 1e-05, %v335_v42  ;;  %v482_v32 = vpop.f32.mrf.mxu0  ;;  %v547_v33 = vpop.f32.mrf.mxu1 }
  0xa5   : > { %v712_v43 = vpop.eup %711  ;;  %v865_v48 = vadd.f32 1e-05, %v337_v38  ;;  %v292_v56 = vpop.xlane.xlu0 %291  ;;  %v548_v46 = vadd.f32 %v547_v33, %v482_v32  ;;  %v571_v33 = vmul.f32 %v870_v49, %v861_v44 }
  0xa6   : > { %v863_v47 = vadd.f32 1e-05, %v336_v37  ;;  %v351_v50 = vmul.f32 %v712_v43, %v850_v23  ;;  %v298_v53 = vpop.xlane.xlu2 %297  ;;  %v314_v62 = vmul.f32 0.0625, %v292_v56  ;;  %vm357_vm1 = vweird.f32 %v712_v43  ;;  %v916_v23 = vpop.f32.mrf.mxu3 }
  0xa7   : > { %v295_v52 = vpop.xlane.xlu1 %294  ;;  %v316_v61 = vmul.f32 0.0625, %v298_v53  ;;  %vm358_vm3 = vmor %vm356_vm2, %vm357_vm1  ;;  %v575_v53 = vsub.f32 %v545_v35, %v884_v2  ;;  %vm386_vm9 = vweird.f32 %v865_v48  ;;  %vm366_vm10 = vweird.f32 %v873_v51 }
  0xa8   : > { %713 = vrsqrt.f32 %v863_v47  ;;  %v352_v58 = vmul.f32 %v712_v43, %v351_v50  ;;  %v315_v59 = vmul.f32 0.0625, %v295_v52  ;;  %v330_v4 = vsub.f32 %v314_v62, %v322_v54 }
  0xa9   : > { %715 = vrsqrt.f32 %v865_v48  ;;  %v332_v3 = vsub.f32 %v316_v61, %v324_v60  ;;  %v325_v52 = vmul.f32 %v925_v22, %v925_v22  ;;  %vm376_vm6 = vweird.f32 %v863_v47 }
  0xaa   : > { %717 = vrsqrt.f32 %v873_v51  ;;  %v353_v0 = vmul.f32 0.5, %v352_v58  ;;  %v331_v1 = vsub.f32 %v315_v59, %v323_v57  ;;  %v338_v13 = vmax.f32 %v330_v4, 0.0  ;;  %v491_v4 = vpop.f32.mrf.mxu2 }
  0xab   : > { %v340_v10 = vmax.f32 %v332_v3, 0.0  ;;  %v576_v59 = vsub.f32 %v548_v46, %v892_v12  ;;  %v551_v12 = vadd.f32 %v859_v41, %v857_v40  ;;  %v569_v35 = vmul.f32 %v870_v49, %v855_v36 }
  0xac   : > { %v354_v6 = vsub.f32 1.5, %v353_v0  ;;  %v339_v7 = vmax.f32 %v331_v1, 0.0  ;;  %v922_v28 = vadd.f32 1e-05, %v338_v13  ;;  %v574_v1 = vsub.f32 %v542_v39, %v906_v24 }
  0xad   : > { %v920_v27 = vadd.f32 1e-05, %v340_v10  ;;  %v301_v38 = vpop.xlane.xlu0 %300 }
  0xae   : > { %v886_v8 = vpop.eup %713  ;;  %v355_v15 = vmul.f32 %v712_v43, %v354_v6  ;;  %v900_v17 = vadd.f32 1e-05, %v339_v7  ;;  %v317_v20 = vmul.f32 0.0625, %v301_v38 }
  0xaf   : > { %v894_v14 = vpop.eup %715  ;;  %v371_v16 = vmul.f32 %v886_v8, %v863_v47  ;;  %vm377_vm4 = vweird.f32 %v886_v8 }
  0xb0   : > { %v902_v21 = vpop.eup %717  ;;  %v381_v26 = vmul.f32 %v894_v14, %v865_v48  ;;  %v359_v29 = vsel %vm358_vm3, %v712_v43, %v355_v15  ;;  %719 = vrsqrt.f32 %v900_v17  ;;  %vm387_vm5 = vweird.f32 %v894_v14  ;;  %vm378_vm8 = vmor %vm376_vm6, %vm377_vm4 }
  0xb1   : > { %v372_v30 = vmul.f32 %v886_v8, %v371_v16  ;;  %v361_v31 = vmul.f32 %v902_v21, %v873_v51  ;;  %v581_v34 = vmul.f32 %v573_v5, %v359_v29  ;;  %721 = vrsqrt.f32 %v920_v27  ;;  %vm388_vm11 = vmor %vm386_vm9, %vm387_vm5  ;;  %v556_v5 = vpop.f32.mrf.mxu3 }
  0xb2   : > { %v382_v37 = vmul.f32 %v894_v14, %v381_v26  ;;  %723 = vrsqrt.f32 %v922_v28  ;;  %vm367_vm7 = vweird.f32 %v902_v21  ;;  %v333_v63 = vsub.f32 %v317_v20, %v325_v52 }
  0xb3   : > { %v373_v11 = vmul.f32 0.5, %v372_v30  ;;  %v362_v42 = vmul.f32 %v902_v21, %v361_v31  ;;  %v590_v43 = vadd.f32 %v911_v18, %v581_v34  ;;  %vm368_vm12 = vmor %vm366_vm10, %vm367_vm7  ;;  %v554_v26 = vadd.f32 %v916_v23, %v914_v25 }
  0xb4   : > { %v383_v45 = vmul.f32 0.5, %v382_v37  ;;  %v341_v24 = vmax.f32 %v333_v63, 0.0  ;;  %v557_v30 = vadd.f32 %v556_v5, %v491_v4  ;;  %vm406_vm14 = vweird.f32 %v900_v17 }
  0xb5   : > { %v374_v50 = vsub.f32 1.5, %v373_v11  ;;  %v363_v19 = vmul.f32 0.5, %v362_v42  ;;  %598 = vst.msk [vmem:[%s937_s7] sm:$0xff] %vm253_vm0, %v590_v43  ;;  %v578_v37 = vsub.f32 %v554_v26, %v889_v9  ;;  %vm416_vm3 = vweird.f32 %v920_v27 }
  0xb6   : > { %v384_v54 = vsub.f32 1.5, %v383_v45  ;;  %v953_v57 = vpop.eup %719  ;;  %v349_v32 = vadd.f32 1e-05, %v341_v24  ;;  %v579_v44 = vsub.f32 %v557_v30, %v571_v33  ;;  %vm396_vm5 = vweird.f32 %v922_v28 }
  0xb7   : > { %v375_v55 = vmul.f32 %v886_v8, %v374_v50  ;;  %v364_v56 = vsub.f32 1.5, %v363_v19  ;;  %v722_v60 = vpop.eup %721  ;;  %v401_v47 = vmul.f32 %v953_v57, %v900_v17  ;;  %vm407_vm13 = vweird.f32 %v953_v57 }
  0xb8   : > { %v385_v58 = vmul.f32 %v894_v14, %v384_v54  ;;  %v724_v0 = vpop.eup %723  ;;  %v411_v2 = vmul.f32 %v722_v60, %v920_v27  ;;  %vm417_vm15 = vweird.f32 %v722_v60  ;;  %725 = vrsqrt.f32 %v349_v32  ;;  %vm408_vm2 = vmor %vm406_vm14, %vm407_vm13 }
  0xb9   : > { %v379_v61 = vsel %vm378_vm8, %v886_v8, %v375_v55  ;;  %v365_v62 = vmul.f32 %v902_v21, %v364_v56  ;;  %v402_v7 = vmul.f32 %v953_v57, %v401_v47  ;;  %v391_v8 = vmul.f32 %v724_v0, %v922_v28  ;;  %vm418_vm4 = vmor %vm416_vm3, %vm417_vm15  ;;  %v494_v28 = vpop.f32.mrf.mxu2  ;;  %v559_v52 = vpop.f32.mrf.mxu3 }
  0xba   : > { %v583_v48 = vmul.f32 %v575_v53, %v379_v61  ;;  %v389_v51 = vsel %vm388_vm11, %v894_v14, %v385_v58  ;;  %v412_v14 = vmul.f32 %v722_v60, %v411_v2  ;;  %vm397_vm1 = vweird.f32 %v724_v0 }
  0xbb   : > { %v369_v3 = vsel %vm368_vm12, %v902_v21, %v365_v62  ;;  %v584_v6 = vmul.f32 %v576_v59, %v389_v51  ;;  %v403_v16 = vmul.f32 0.5, %v402_v7  ;;  %v392_v21 = vmul.f32 %v724_v0, %v391_v8  ;;  %vm398_vm6 = vmor %vm396_vm5, %vm397_vm1 }
  0xbc   : > { %v592_v10 = vadd.f32 %v911_v18, %v583_v48  ;;  %v582_v13 = vmul.f32 %v574_v1, %v369_v3  ;;  %v413_v31 = vmul.f32 0.5, %v412_v14  ;;  %v577_v11 = vsub.f32 %v551_v12, %v569_v35 }
  0xbd   : > { %v593_v15 = vadd.f32 %v911_v18, %v584_v6  ;;  %v404_v40 = vsub.f32 1.5, %v403_v16  ;;  %v393_v41 = vmul.f32 0.5, %v392_v21  ;;  %v560_v55 = vadd.f32 %v559_v52, %v494_v28 }
  0xbe   : > { %600 = vst.msk [vmem:[%s937_s7 + $0x10] sm:$0xff] %vm253_vm0, %v592_v10  ;;  %v591_v29 = vadd.f32 %v911_v18, %v582_v13  ;;  %v414_v25 = vsub.f32 1.5, %v413_v31  ;;  %v726_v46 = vpop.eup %725  ;;  %vm426_vm8 = vweird.f32 %v349_v32 }
  0xbf   : > { %601 = vst.msk [vmem:[%s937_s7 + $0x18] sm:$0xff] %vm253_vm0, %v593_v15  ;;  %v405_v23 = vmul.f32 %v953_v57, %v404_v40  ;;  %v394_v34 = vsub.f32 1.5, %v393_v41  ;;  %v421_v20 = vmul.f32 %v726_v46, %v349_v32  ;;  %vm427_vm7 = vweird.f32 %v726_v46 }
  0xc0   : > { %599 = vst.msk [vmem:[%s937_s7 + $0x8] sm:$0xff] %vm253_vm0, %v591_v29  ;;  %v415_v38 = vmul.f32 %v722_v60, %v414_v25  ;;  %vm428_vm9 = vmor %vm426_vm8, %vm427_vm7 }
  0xc1   : > { %v409_v17 = vsel %vm408_vm2, %v953_v57, %v405_v23  ;;  %v395_v39 = vmul.f32 %v724_v0, %v394_v34  ;;  %v422_v53 = vmul.f32 %v726_v46, %v421_v20  ;;  %v572_v57 = vmul.f32 %v870_v49, %v925_v22 }
  0xc2   : > { %v586_v42 = vmul.f32 %v578_v37, %v409_v17  ;;  %v419_v43 = vsel %vm418_vm4, %v722_v60, %v415_v38 }
  0xc3   : > { %v587_v36 = vmul.f32 %v579_v44, %v419_v43  ;;  %v399_v9 = vsel %vm398_vm6, %v724_v0, %v395_v39  ;;  %v423_v54 = vmul.f32 0.5, %v422_v53  ;;  %v580_v59 = vsub.f32 %v560_v55, %v572_v57 }
  0xc4   : > { %v595_v45 = vadd.f32 %v911_v18, %v586_v42  ;;  %v585_v27 = vmul.f32 %v577_v11, %v399_v9 }
  0xc5   : > { %v596_v50 = vadd.f32 %v911_v18, %v587_v36  ;;  %v424_v56 = vsub.f32 1.5, %v423_v54 }
  0xc6   : > { %603 = vst.msk [vmem:[%s937_s7 + $0x28] sm:$0xff] %vm253_vm0, %v595_v45  ;;  %v594_v19 = vadd.f32 %v911_v18, %v585_v27 }
  0xc7   : > { %604 = vst.msk [vmem:[%s937_s7 + $0x30] sm:$0xff] %vm253_vm0, %v596_v50  ;;  %v425_v58 = vmul.f32 %v726_v46, %v424_v56 }
  0xc8   : > { %602 = vst.msk [vmem:[%s937_s7 + $0x20] sm:$0xff] %vm253_vm0, %v594_v19 }
  0xc9   : > { %v429_v60 = vsel %vm428_vm9, %v726_v46, %v425_v58 }
  0xca   : > { %v588_v61 = vmul.f32 %v580_v59, %v429_v60 }
  0xcc   : > { %v597_v62 = vadd.f32 %v911_v18, %v588_v61 }
  0xce   : > { %605 = vst.msk [vmem:[%s937_s7 + $0x38] sm:$0xff] %vm253_vm0, %v597_v62 }
  0xcf PF: > { %s14_s15 = sadd.s32 1, %s733_s15  }
  0xd0   : > { %p11_p4 = scmp.ge.s32.totalorder %s14_s15, 4  }
  0xd2   :  { %13 = sbr.rel (!%p11_p4) target bundleno = 1 (0x1), region = 67 }

</bundles_post_ra>
